<compile_context>
chip_gen: v6e
topology: v6e:2x2x1
jax: 0.10.0
libtpu: 0.0.40
codegen_flags: <defaults>
</compile_context>

<pallas_src>
import jax
import jax.numpy as jnp
from jax import lax
from jax.experimental import pallas as pl
from jax.experimental.pallas import tpu as pltpu

# ----- model sizes (stand-ins for src.models.x_size / src.models.z_size) -----
X_SIZE = 16
Z_SIZE = 8
H1 = 32
H2 = 128
BN_EPS = 1e-5
LEAKY_SLOPE = 0.01  # nn.LeakyReLU default

F1 = 2 * H1       # 64 : layer-1 outputs packed [mu | lv] along lanes
F3 = 2 * Z_SIZE   # 16 : layer-3 weights packed [mu | lv] along lanes

# ---- dense bf16 weight slab: 208 rows x 128 lanes (row offsets 16-aligned) ----
W1_OFF = 0                   # rows  0: 16, cols 0:64   -> [mu_W1 | lv_W1]
W2M_OFF = W1_OFF + X_SIZE    # rows 16: 48, cols 0:128  -> mu_W2
W2V_OFF = W2M_OFF + H1       # rows 48: 80, cols 0:128  -> lv_W2
W3_OFF = W2V_OFF + H1        # rows 80:208, cols 0:16   -> [mu_W3 | lv_W3]
W_ROWS = W3_OFF + H2         # 208
W_COLS = H2                  # 128

# ---- f32 affine slab: 8 rows x 128 lanes (gamma/beta/bias) ----
G1_ROW, B1_ROW, G2M_ROW, B2M_ROW, G2V_ROW, B2V_ROW, BIAS3_ROW = range(7)
AFF_ROWS = 8


# ------------------------------ kernel ---------------------------------------
def vaee_kernel(x_ref, eps_ref, w_ref, aff_ref, z_ref, mu_ref, sigma_ref):
    x = x_ref[...]            # (B, 16) f32
    eps = eps_ref[...]        # (B, 8)  f32

    # static slices of the packed bf16 weight slab (zero runtime cost)
    w1 = w_ref[W1_OFF:W1_OFF + X_SIZE, :F1]     # (16, 64)   [mu_W1 | lv_W1]
    w2m = w_ref[W2M_OFF:W2M_OFF + H1, :]        # (32, 128)  mu_W2
    w2v = w_ref[W2V_OFF:W2V_OFF + H1, :]        # (32, 128)  lv_W2
    w3 = w_ref[W3_OFF:W3_OFF + H2, :F3]         # (128, 16)  [mu_W3 | lv_W3]

    aff = aff_ref[...]                          # (8, 128) f32
    g1 = aff[G1_ROW:G1_ROW + 1, :F1]
    b1 = aff[B1_ROW:B1_ROW + 1, :F1]
    g2m = aff[G2M_ROW:G2M_ROW + 1, :]
    b2m = aff[B2M_ROW:B2M_ROW + 1, :]
    g2v = aff[G2V_ROW:G2V_ROW + 1, :]
    b2v = aff[B2V_ROW:B2V_ROW + 1, :]
    bias3 = aff[BIAS3_ROW:BIAS3_ROW + 1, :F3]

    def bn_leaky(h, gamma, beta):
        # PyTorch BatchNorm1d training-mode forward: batch stats over the
        # resident block, biased variance, centered two-pass form (f32).
        mean = jnp.mean(h, axis=0, keepdims=True)
        c = h - mean
        var = jnp.mean(c * c, axis=0, keepdims=True)
        h = c * (gamma * lax.rsqrt(var + BN_EPS)) + beta
        return jnp.where(h >= 0, h, LEAKY_SLOPE * h)

    def mm(a, b):
        # bf16 operands, f32 accumulation on the MXU
        return jnp.dot(a.astype(jnp.bfloat16), b,
                       preferred_element_type=jnp.float32)

    # layer 1: both branches share x -> one fused (16, 64) matmul
    h1 = bn_leaky(mm(x, w1), g1, b1)                       # (B, 64)
    h1m = h1[:, :H1]
    h1v = h1[:, H1:]

    # layers 2-3: per-branch dense matmuls (BN is per-feature, so the two
    # branches never mix lanes)
    h2m = bn_leaky(mm(h1m, w2m), g2m, b2m)                 # (B, 128)
    h2v = bn_leaky(mm(h1v, w2v), g2v, b2v)                 # (B, 128)

    mu = mm(h2m, w3[:, :Z_SIZE]) + bias3[:, :Z_SIZE]       # (B, 8)
    log_var = mm(h2v, w3[:, Z_SIZE:]) + bias3[:, Z_SIZE:]  # (B, 8)

    sigma = jnp.exp(0.5 * log_var)
    z = eps * sigma + mu

    z_ref[...] = z
    mu_ref[...] = mu
    sigma_ref[...] = sigma


# ------------------------------ wrapper ---------------------------------------
def pack_params(params):
    """Pack the 16 per-layer parameter arrays into a dense bf16 weight slab
    and a small f32 affine slab."""
    (mw1, mg1, mb1, mw2, mg2, mb2, mw3, mbias3,
     vw1, vg1, vb1, vw2, vg2, vb2, vw3, vbias3) = params

    w = jnp.zeros((W_ROWS, W_COLS), jnp.float32)
    w = w.at[W1_OFF:W1_OFF + X_SIZE, 0:H1].set(mw1)
    w = w.at[W1_OFF:W1_OFF + X_SIZE, H1:F1].set(vw1)
    w = w.at[W2M_OFF:W2M_OFF + H1, :].set(mw2)
    w = w.at[W2V_OFF:W2V_OFF + H1, :].set(vw2)
    w = w.at[W3_OFF:W3_OFF + H2, 0:Z_SIZE].set(mw3)
    w = w.at[W3_OFF:W3_OFF + H2, Z_SIZE:F3].set(vw3)
    w_slab = w.astype(jnp.bfloat16)

    aff = jnp.zeros((AFF_ROWS, W_COLS), jnp.float32)
    aff = aff.at[G1_ROW, 0:H1].set(mg1[0]).at[G1_ROW, H1:F1].set(vg1[0])
    aff = aff.at[B1_ROW, 0:H1].set(mb1[0]).at[B1_ROW, H1:F1].set(vb1[0])
    aff = aff.at[G2M_ROW, :].set(mg2[0])
    aff = aff.at[B2M_ROW, :].set(mb2[0])
    aff = aff.at[G2V_ROW, :].set(vg2[0])
    aff = aff.at[B2V_ROW, :].set(vb2[0])
    aff = aff.at[BIAS3_ROW, 0:Z_SIZE].set(mbias3[0])
    aff = aff.at[BIAS3_ROW, Z_SIZE:F3].set(vbias3[0])
    return w_slab, aff


@jax.jit
def vaee_forward(x, epsilon, w_slab, aff_slab):
    B = x.shape[0]
    vmem = pl.BlockSpec(memory_space=pltpu.MemorySpace.VMEM)
    z, mu, sigma = pl.pallas_call(
        vaee_kernel,
        out_shape=(
            jax.ShapeDtypeStruct((B, Z_SIZE), jnp.float32),
            jax.ShapeDtypeStruct((B, Z_SIZE), jnp.float32),
            jax.ShapeDtypeStruct((B, Z_SIZE), jnp.float32),
        ),
        in_specs=[vmem, vmem, vmem, vmem],
        out_specs=(vmem, vmem, vmem),
        # Footprint < 100 KB: no grid, no vmem_limit_bytes, no extra buffering.
        # For a serving loop, add a leading grid axis over batches with a
        # constant-index weight BlockSpec so weights stay VMEM-resident.
    )(x, epsilon, w_slab, aff_slab)
    return z, mu, sigma


# ------------------------------ init & reference ------------------------------
def init_params(key):
    """Deterministic init mirroring init_weights():
    Linear.weight ~ N(0, 0.02), Linear.bias = 0,
    BatchNorm1d.weight ~ N(1, 0.02), BatchNorm1d.bias = 0."""
    ks = jax.random.split(key, 8)

    def linear_w(k, fan_in, fan_out):
        return (0.02 * jax.random.normal(k, (fan_in, fan_out))).astype(jnp.float32)

    def bn(k, n):
        gamma = (1.0 + 0.02 * jax.random.normal(k, (1, n))).astype(jnp.float32)
        beta = jnp.zeros((1, n), jnp.float32)
        return gamma, beta

    def branch(k0, k1, k2, k3):
        w1 = linear_w(k0, X_SIZE, H1)
        g1, b1 = bn(k1, H1)
        w2 = linear_w(k2, H1, H2)
        g2, b2 = bn(k3, H2)
        w3 = linear_w(jax.random.fold_in(k0, 7), H2, Z_SIZE)
        bias3 = jnp.zeros((1, Z_SIZE), jnp.float32)
        return [w1, g1, b1, w2, g2, b2, w3, bias3]

    mu_params = branch(ks[0], ks[1], ks[2], ks[3])
    lv_params = branch(ks[4], ks[5], ks[6], ks[7])
    return mu_params + lv_params


def _ref_bn(h, gamma, beta):
    mean = jnp.mean(h, axis=0, keepdims=True)
    var = jnp.mean((h - mean) * (h - mean), axis=0, keepdims=True)
    return (h - mean) * lax.rsqrt(var + BN_EPS) * gamma + beta


def _ref_leaky(h):
    return jnp.where(h >= 0, h, LEAKY_SLOPE * h)


def reference_forward(x, epsilon, params):
    """Pure-f32 reference matching the PyTorch module's forward."""
    (mw1, mg1, mb1, mw2, mg2, mb2, mw3, mbias3,
     vw1, vg1, vb1, vw2, vg2, vb2, vw3, vbias3) = params

    def branch(w1, g1, b1, w2, g2, b2, w3, bias3):
        h = x @ w1
        h = _ref_leaky(_ref_bn(h, g1, b1))
        h = h @ w2
        h = _ref_leaky(_ref_bn(h, g2, b2))
        return h @ w3 + bias3

    mu = branch(mw1, mg1, mb1, mw2, mg2, mb2, mw3, mbias3)
    log_var = branch(vw1, vg1, vb1, vw2, vg2, vb2, vw3, vbias3)
    sigma = jnp.exp(0.5 * log_var)
    z = epsilon * sigma + mu
    return z, mu, sigma


# ------------------------------ main ------------------------------------------
if __name__ == "__main__":
    key = jax.random.PRNGKey(0)
    k_x, k_eps, k_params = jax.random.split(key, 3)

    B = 8
    x = jax.random.normal(k_x, (B, X_SIZE), dtype=jnp.float32)
    epsilon = jax.random.normal(k_eps, (B, Z_SIZE), dtype=jnp.float32)
    params = init_params(k_params)
    w_slab, aff_slab = pack_params(params)

    z, mu, sigma = vaee_forward(x, epsilon, w_slab, aff_slab)
    jax.block_until_ready((z, mu, sigma))

    # bf16 weights + f32 accumulation vs the pure-f32 reference: ~1e-3 level
    # deviations on O(0.2-1) values; 5e-3 tolerance comfortably covers it.
    z_ref, mu_ref, sigma_ref = reference_forward(x, epsilon, params)
    assert jnp.allclose(z, z_ref, atol=5e-3, rtol=5e-3)
    assert jnp.allclose(mu, mu_ref, atol=5e-3, rtol=5e-3)
    assert jnp.allclose(sigma, sigma_ref, atol=5e-3, rtol=5e-3)

    print("KERNEL_OK")
</pallas_src>

<mosaic_0001>
module attributes {stable_mosaic.version = 11 : i64} {
  func.func @vaee_kernel(%arg0: memref<8x16xf32, #tpu.memory_space<vmem>>, %arg1: memref<8x8xf32, #tpu.memory_space<vmem>>, %arg2: memref<208x128xbf16, #tpu.memory_space<vmem>>, %arg3: memref<8x128xf32, #tpu.memory_space<vmem>>, %arg4: memref<8x8xf32, #tpu.memory_space<vmem>>, %arg5: memref<8x8xf32, #tpu.memory_space<vmem>>, %arg6: memref<8x8xf32, #tpu.memory_space<vmem>>) attributes {dimension_semantics = [], scalar_prefetch = 0 : i64, scratch_operands = 0 : i64, tpu.core_type = #tpu.core_type<tc>} {
    %c0 = arith.constant 0 : index
    %c0_0 = arith.constant 0 : index
    %0 = vector.load %arg0[%c0, %c0_0] : memref<8x16xf32, #tpu.memory_space<vmem>>, vector<8x16xf32>
    %c0_1 = arith.constant 0 : index
    %c0_2 = arith.constant 0 : index
    %1 = vector.load %arg1[%c0_1, %c0_2] : memref<8x8xf32, #tpu.memory_space<vmem>>, vector<8x8xf32>
    %c0_3 = arith.constant 0 : index
    %c0_4 = arith.constant 0 : index
    %2 = vector.load %arg2[%c0_3, %c0_4] : memref<208x128xbf16, #tpu.memory_space<vmem>>, vector<16x64xbf16>
    %c16 = arith.constant 16 : index
    %c0_5 = arith.constant 0 : index
    %3 = vector.load %arg2[%c16, %c0_5] : memref<208x128xbf16, #tpu.memory_space<vmem>>, vector<32x128xbf16>
    %c48 = arith.constant 48 : index
    %c0_6 = arith.constant 0 : index
    %4 = vector.load %arg2[%c48, %c0_6] : memref<208x128xbf16, #tpu.memory_space<vmem>>, vector<32x128xbf16>
    %c80 = arith.constant 80 : index
    %c0_7 = arith.constant 0 : index
    %5 = vector.load %arg2[%c80, %c0_7] : memref<208x128xbf16, #tpu.memory_space<vmem>>, vector<128x16xbf16>
    %c0_8 = arith.constant 0 : index
    %c0_9 = arith.constant 0 : index
    %6 = vector.load %arg3[%c0_8, %c0_9] : memref<8x128xf32, #tpu.memory_space<vmem>>, vector<8x128xf32>
    %7 = vector.extract_strided_slice %6 {offsets = [0, 0], sizes = [1, 64], strides = [1, 1]} : vector<8x128xf32> to vector<1x64xf32>
    %8 = vector.extract_strided_slice %6 {offsets = [1, 0], sizes = [1, 64], strides = [1, 1]} : vector<8x128xf32> to vector<1x64xf32>
    %9 = vector.extract_strided_slice %6 {offsets = [2, 0], sizes = [1, 128], strides = [1, 1]} : vector<8x128xf32> to vector<1x128xf32>
    %10 = vector.extract_strided_slice %6 {offsets = [3, 0], sizes = [1, 128], strides = [1, 1]} : vector<8x128xf32> to vector<1x128xf32>
    %11 = vector.extract_strided_slice %6 {offsets = [4, 0], sizes = [1, 128], strides = [1, 1]} : vector<8x128xf32> to vector<1x128xf32>
    %12 = vector.extract_strided_slice %6 {offsets = [5, 0], sizes = [1, 128], strides = [1, 1]} : vector<8x128xf32> to vector<1x128xf32>
    %13 = vector.extract_strided_slice %6 {offsets = [6, 0], sizes = [1, 16], strides = [1, 1]} : vector<8x128xf32> to vector<1x16xf32>
    %14 = arith.truncf %0 : vector<8x16xf32> to vector<8x16xbf16>
    %cst = arith.constant dense<0.000000e+00> : vector<8x64xf32>
    %15 = tpu.matmul %14, %2, %cst {dimension_numbers = #tpu.dot_dimension_numbers<[1], [0], [0], [1], [0, 0, 1, 1], [], []>} : vector<8x16xbf16>, vector<16x64xbf16>, vector<8x64xf32> -> vector<8x64xf32>
    %cst_10 = arith.constant dense<0.000000e+00> : vector<64xf32>
    %16 = vector.multi_reduction <add>, %15, %cst_10 [0] : vector<8x64xf32> to vector<64xf32>
    %17 = vector.shape_cast %16 : vector<64xf32> to vector<1x64xf32>
    %cst_11 = arith.constant 8.000000e+00 : f32
    %18 = vector.broadcast %cst_11 : f32 to vector<1x64xf32>
    %19 = arith.divf %17, %18 : vector<1x64xf32>
    %20 = vector.broadcast %19 : vector<1x64xf32> to vector<8x64xf32>
    %21 = arith.subf %15, %20 : vector<8x64xf32>
    %22 = arith.mulf %21, %21 : vector<8x64xf32>
    %cst_12 = arith.constant dense<0.000000e+00> : vector<64xf32>
    %23 = vector.multi_reduction <add>, %22, %cst_12 [0] : vector<8x64xf32> to vector<64xf32>
    %24 = vector.shape_cast %23 : vector<64xf32> to vector<1x64xf32>
    %cst_13 = arith.constant 8.000000e+00 : f32
    %25 = vector.broadcast %cst_13 : f32 to vector<1x64xf32>
    %26 = arith.divf %24, %25 : vector<1x64xf32>
    %cst_14 = arith.constant 9.99999974E-6 : f32
    %27 = vector.broadcast %cst_14 : f32 to vector<1x64xf32>
    %28 = arith.addf %26, %27 : vector<1x64xf32>
    %29 = math.rsqrt %28 : vector<1x64xf32>
    %30 = arith.mulf %7, %29 : vector<1x64xf32>
    %31 = vector.broadcast %30 : vector<1x64xf32> to vector<8x64xf32>
    %32 = arith.mulf %21, %31 : vector<8x64xf32>
    %33 = vector.broadcast %8 : vector<1x64xf32> to vector<8x64xf32>
    %34 = arith.addf %32, %33 : vector<8x64xf32>
    %cst_15 = arith.constant 0.000000e+00 : f32
    %35 = vector.broadcast %cst_15 : f32 to vector<8x64xf32>
    %36 = arith.cmpf oge, %34, %35 : vector<8x64xf32>
    %cst_16 = arith.constant 0.00999999977 : f32
    %37 = vector.broadcast %cst_16 : f32 to vector<8x64xf32>
    %38 = arith.mulf %37, %34 : vector<8x64xf32>
    %39 = arith.select %36, %34, %38 : vector<8x64xi1>, vector<8x64xf32>
    %40 = vector.extract_strided_slice %39 {offsets = [0, 0], sizes = [8, 32], strides = [1, 1]} : vector<8x64xf32> to vector<8x32xf32>
    %41 = vector.extract_strided_slice %39 {offsets = [0, 32], sizes = [8, 32], strides = [1, 1]} : vector<8x64xf32> to vector<8x32xf32>
    %42 = arith.truncf %40 : vector<8x32xf32> to vector<8x32xbf16>
    %cst_17 = arith.constant dense<0.000000e+00> : vector<8x128xf32>
    %43 = tpu.matmul %42, %3, %cst_17 {dimension_numbers = #tpu.dot_dimension_numbers<[1], [0], [0], [1], [0, 0, 1, 1], [], []>} : vector<8x32xbf16>, vector<32x128xbf16>, vector<8x128xf32> -> vector<8x128xf32>
    %cst_18 = arith.constant dense<0.000000e+00> : vector<128xf32>
    %44 = vector.multi_reduction <add>, %43, %cst_18 [0] : vector<8x128xf32> to vector<128xf32>
    %45 = vector.shape_cast %44 : vector<128xf32> to vector<1x128xf32>
    %cst_19 = arith.constant 8.000000e+00 : f32
    %46 = vector.broadcast %cst_19 : f32 to vector<1x128xf32>
    %47 = arith.divf %45, %46 : vector<1x128xf32>
    %48 = vector.broadcast %47 : vector<1x128xf32> to vector<8x128xf32>
    %49 = arith.subf %43, %48 : vector<8x128xf32>
    %50 = arith.mulf %49, %49 : vector<8x128xf32>
    %cst_20 = arith.constant dense<0.000000e+00> : vector<128xf32>
    %51 = vector.multi_reduction <add>, %50, %cst_20 [0] : vector<8x128xf32> to vector<128xf32>
    %52 = vector.shape_cast %51 : vector<128xf32> to vector<1x128xf32>
    %cst_21 = arith.constant 8.000000e+00 : f32
    %53 = vector.broadcast %cst_21 : f32 to vector<1x128xf32>
    %54 = arith.divf %52, %53 : vector<1x128xf32>
    %cst_22 = arith.constant 9.99999974E-6 : f32
    %55 = vector.broadcast %cst_22 : f32 to vector<1x128xf32>
    %56 = arith.addf %54, %55 : vector<1x128xf32>
    %57 = math.rsqrt %56 : vector<1x128xf32>
    %58 = arith.mulf %9, %57 : vector<1x128xf32>
    %59 = vector.broadcast %58 : vector<1x128xf32> to vector<8x128xf32>
    %60 = arith.mulf %49, %59 : vector<8x128xf32>
    %61 = vector.broadcast %10 : vector<1x128xf32> to vector<8x128xf32>
    %62 = arith.addf %60, %61 : vector<8x128xf32>
    %cst_23 = arith.constant 0.000000e+00 : f32
    %63 = vector.broadcast %cst_23 : f32 to vector<8x128xf32>
    %64 = arith.cmpf oge, %62, %63 : vector<8x128xf32>
    %cst_24 = arith.constant 0.00999999977 : f32
    %65 = vector.broadcast %cst_24 : f32 to vector<8x128xf32>
    %66 = arith.mulf %65, %62 : vector<8x128xf32>
    %67 = arith.select %64, %62, %66 : vector<8x128xi1>, vector<8x128xf32>
    %68 = arith.truncf %41 : vector<8x32xf32> to vector<8x32xbf16>
    %cst_25 = arith.constant dense<0.000000e+00> : vector<8x128xf32>
    %69 = tpu.matmul %68, %4, %cst_25 {dimension_numbers = #tpu.dot_dimension_numbers<[1], [0], [0], [1], [0, 0, 1, 1], [], []>} : vector<8x32xbf16>, vector<32x128xbf16>, vector<8x128xf32> -> vector<8x128xf32>
    %cst_26 = arith.constant dense<0.000000e+00> : vector<128xf32>
    %70 = vector.multi_reduction <add>, %69, %cst_26 [0] : vector<8x128xf32> to vector<128xf32>
    %71 = vector.shape_cast %70 : vector<128xf32> to vector<1x128xf32>
    %cst_27 = arith.constant 8.000000e+00 : f32
    %72 = vector.broadcast %cst_27 : f32 to vector<1x128xf32>
    %73 = arith.divf %71, %72 : vector<1x128xf32>
    %74 = vector.broadcast %73 : vector<1x128xf32> to vector<8x128xf32>
    %75 = arith.subf %69, %74 : vector<8x128xf32>
    %76 = arith.mulf %75, %75 : vector<8x128xf32>
    %cst_28 = arith.constant dense<0.000000e+00> : vector<128xf32>
    %77 = vector.multi_reduction <add>, %76, %cst_28 [0] : vector<8x128xf32> to vector<128xf32>
    %78 = vector.shape_cast %77 : vector<128xf32> to vector<1x128xf32>
    %cst_29 = arith.constant 8.000000e+00 : f32
    %79 = vector.broadcast %cst_29 : f32 to vector<1x128xf32>
    %80 = arith.divf %78, %79 : vector<1x128xf32>
    %cst_30 = arith.constant 9.99999974E-6 : f32
    %81 = vector.broadcast %cst_30 : f32 to vector<1x128xf32>
    %82 = arith.addf %80, %81 : vector<1x128xf32>
    %83 = math.rsqrt %82 : vector<1x128xf32>
    %84 = arith.mulf %11, %83 : vector<1x128xf32>
    %85 = vector.broadcast %84 : vector<1x128xf32> to vector<8x128xf32>
    %86 = arith.mulf %75, %85 : vector<8x128xf32>
    %87 = vector.broadcast %12 : vector<1x128xf32> to vector<8x128xf32>
    %88 = arith.addf %86, %87 : vector<8x128xf32>
    %cst_31 = arith.constant 0.000000e+00 : f32
    %89 = vector.broadcast %cst_31 : f32 to vector<8x128xf32>
    %90 = arith.cmpf oge, %88, %89 : vector<8x128xf32>
    %cst_32 = arith.constant 0.00999999977 : f32
    %91 = vector.broadcast %cst_32 : f32 to vector<8x128xf32>
    %92 = arith.mulf %91, %88 : vector<8x128xf32>
    %93 = arith.select %90, %88, %92 : vector<8x128xi1>, vector<8x128xf32>
    %94 = vector.extract_strided_slice %5 {offsets = [0, 0], sizes = [128, 8], strides = [1, 1]} : vector<128x16xbf16> to vector<128x8xbf16>
    %95 = arith.truncf %67 : vector<8x128xf32> to vector<8x128xbf16>
    %cst_33 = arith.constant dense<0.000000e+00> : vector<8x8xf32>
    %96 = tpu.matmul %95, %94, %cst_33 {dimension_numbers = #tpu.dot_dimension_numbers<[1], [0], [0], [1], [0, 0, 1, 1], [], []>} : vector<8x128xbf16>, vector<128x8xbf16>, vector<8x8xf32> -> vector<8x8xf32>
    %97 = vector.extract_strided_slice %13 {offsets = [0, 0], sizes = [1, 8], strides = [1, 1]} : vector<1x16xf32> to vector<1x8xf32>
    %98 = vector.broadcast %97 : vector<1x8xf32> to vector<8x8xf32>
    %99 = arith.addf %96, %98 : vector<8x8xf32>
    %100 = vector.extract_strided_slice %5 {offsets = [0, 8], sizes = [128, 8], strides = [1, 1]} : vector<128x16xbf16> to vector<128x8xbf16>
    %101 = arith.truncf %93 : vector<8x128xf32> to vector<8x128xbf16>
    %cst_34 = arith.constant dense<0.000000e+00> : vector<8x8xf32>
    %102 = tpu.matmul %101, %100, %cst_34 {dimension_numbers = #tpu.dot_dimension_numbers<[1], [0], [0], [1], [0, 0, 1, 1], [], []>} : vector<8x128xbf16>, vector<128x8xbf16>, vector<8x8xf32> -> vector<8x8xf32>
    %103 = vector.extract_strided_slice %13 {offsets = [0, 8], sizes = [1, 8], strides = [1, 1]} : vector<1x16xf32> to vector<1x8xf32>
    %104 = vector.broadcast %103 : vector<1x8xf32> to vector<8x8xf32>
    %105 = arith.addf %102, %104 : vector<8x8xf32>
    %cst_35 = arith.constant 5.000000e-01 : f32
    %106 = vector.broadcast %cst_35 : f32 to vector<8x8xf32>
    %107 = arith.mulf %106, %105 : vector<8x8xf32>
    %108 = math.exp %107 : vector<8x8xf32>
    %109 = arith.mulf %1, %108 : vector<8x8xf32>
    %110 = arith.addf %109, %99 : vector<8x8xf32>
    %c0_36 = arith.constant 0 : index
    %c0_37 = arith.constant 0 : index
    %111 = vector.load %arg4[%c0_36, %c0_37] : memref<8x8xf32, #tpu.memory_space<vmem>>, vector<8x8xf32>
    tpu.vector_store %arg4[%c0_36, %c0_37], %110 {strides = array<i32>} : memref<8x8xf32, #tpu.memory_space<vmem>>, vector<8x8xf32>,
    %c0_38 = arith.constant 0 : index
    %c0_39 = arith.constant 0 : index
    %112 = vector.load %arg5[%c0_38, %c0_39] : memref<8x8xf32, #tpu.memory_space<vmem>>, vector<8x8xf32>
    tpu.vector_store %arg5[%c0_38, %c0_39], %99 {strides = array<i32>} : memref<8x8xf32, #tpu.memory_space<vmem>>, vector<8x8xf32>,
    %c0_40 = arith.constant 0 : index
    %c0_41 = arith.constant 0 : index
    %113 = vector.load %arg6[%c0_40, %c0_41] : memref<8x8xf32, #tpu.memory_space<vmem>>, vector<8x8xf32>
    tpu.vector_store %arg6[%c0_40, %c0_41], %108 {strides = array<i32>} : memref<8x8xf32, #tpu.memory_space<vmem>>, vector<8x8xf32>,
    return
  }
}

</mosaic_0001>

<bundles_post_ra>
// kernel: vaee_forward.1
= control target key start
LH: loop header
LB: loop body
LE: loop exit
PB: predicated region body
PF: predicated region fallthrough
CT: control target
= control target key end

     0   :  { %12 = vsyncpa [#allocation3], 0  ;;  %s1002_s0 = inlined_call_operand.hbm [shape: f32[8,16], index: 0, kind: input, shape index: {}]   ;;  %s1003_s1 = inlined_call_operand.hbm [shape: f32[8,8], index: 1, kind: input, shape index: {}]   ;;  %s1004_s2 = inlined_call_operand.hbm [shape: bf16[208,128], index: 2, kind: input, shape index: {}]   ;;  %s1005_s3 = inlined_call_operand.hbm [shape: f32[8,128], index: 3, kind: input, shape index: {}]   ;;  %s1006_s4 = inlined_call_operand.hbm [shape: f32[8,8], index: 4, kind: output, shape index: {0}]   ;;  %s1007_s5 = inlined_call_operand.hbm [shape: f32[8,8], index: 5, kind: output, shape index: {1}]   ;;  %s1008_s6 = inlined_call_operand.hbm [shape: f32[8,8], index: 6, kind: output, shape index: {2}]  }
   0x1   :  { %13 = vsyncpa [#allocation6], 0 }
   0x2   :  { %14 = vsyncpa [#allocation9], 0 }
   0x3   :  { %15 = vsyncpa [#allocation4], 0 }
   0x4   :  { %16 = vsyncpa [#allocation12], 0  ;;  %s870_s21 = smov [#allocation5]   ;;  %s871_s23 = smov [#allocation2]  }
   0x5   :  { %s33_s22 = sshll.u32 %s870_s21, 4  ;;  %s23_s24 = sshll.u32 %s871_s23, 4  ;;  %s34_s22 = int_to_ptr.vmem [resolvable:$true] %s33_s22  ;;  %s24_s24 = int_to_ptr.vmem [resolvable:$true] %s23_s24 }
   0x6   :  { %s728_s25 = scalar_lea.vmem %s34_s22, 128  ;;  %p733_p1 = scmp.lt.s32.totalorder %s34_s22, %s34_s22 }
   0x7   :  { %p729_p0 = scmp.ne.s32.totalorder %s34_s22, %s728_s25  ;;  %p734_p2 = scmp.lt.s32.totalorder %s728_s25, %s728_s25 }
   0x9   :  { %p735_p3 = por %p734_p2, %p733_p1 }
   0xb   :  { %p736_p4 = pnand %p735_p3, %p729_p0 }
   0xd   :  { %739 = shalt.err (!%p736_p4)
}
   0xe   :  { %36 = dma.hbm_to_vmem [thread:$0]  %s1003_s1, 128, %s34_s22, [#allocation6]  }
   0xf   :  { %s748_s28 = scalar_lea.vmem %s24_s24, 128  ;;  %p753_p6 = scmp.lt.s32.totalorder %s24_s24, %s24_s24 }
  0x10   :  { %p749_p5 = scmp.ne.s32.totalorder %s24_s24, %s748_s28  ;;  %p754_p7 = scmp.lt.s32.totalorder %s748_s28, %s748_s28 }
  0x12   :  { %p755_p8 = por %p754_p7, %p753_p6 }
  0x14   :  { %p756_p9 = pnand %p755_p8, %p749_p5 }
  0x16   :  { %759 = shalt.err (!%p756_p9)
}
  0x17   :  { %26 = dma.hbm_to_vmem [thread:$0]  %s1002_s0, 128, %s24_s24, [#allocation3]  }
  0x18   :  { %s872_s7 = smov [#allocation7]  }
  0x19   :  { %s42_s8 = sshll.u32 %s872_s7, 4  ;;  %s43_s8 = int_to_ptr.vmem [resolvable:$true] %s42_s8 }
  0x1a   :  { %s768_s9 = scalar_lea.vmem %s43_s8, 1664  ;;  %p773_p11 = scmp.lt.s32.totalorder %s43_s8, %s43_s8 }
  0x1b   :  { %p769_p10 = scmp.ne.s32.totalorder %s43_s8, %s768_s9  ;;  %p774_p12 = scmp.lt.s32.totalorder %s768_s9, %s768_s9 }
  0x1d   :  { %p775_p13 = por %p774_p12, %p773_p11 }
  0x1f   :  { %p776_p0 = pnand %p775_p13, %p769_p10 }
  0x21   :  { %779 = shalt.err (!%p776_p0)
}
  0x22   :  { %s873_s1 = smov 64   ;;  %s874_s10 = smov 4  }
  0x23   :  { %48 = dma.hbm_to_vmem [thread:$0]  %s1004_s2, 1664, %s43_s8, [#allocation6], %s873_s1, %s873_s1, %s874_s10  }
  0x24   :  { %s875_s13 = smov [#allocation8]  }
  0x25   :  { %s55_s14 = sshll.u32 %s875_s13, 4  ;;  %s56_s14 = int_to_ptr.vmem [resolvable:$true] %s55_s14 }
  0x26   :  { %s788_s0 = scalar_lea.vmem %s56_s14, 128  ;;  %p793_p2 = scmp.lt.s32.totalorder %s56_s14, %s56_s14 }
  0x27   :  { %p789_p1 = scmp.ne.s32.totalorder %s56_s14, %s788_s0  ;;  %p794_p3 = scmp.lt.s32.totalorder %s788_s0, %s788_s0 }
  0x29   :  { %p795_p4 = por %p794_p3, %p793_p2 }
  0x2b   :  { %p796_p5 = pnand %p795_p4, %p789_p1 }
  0x2d   :  { %799 = shalt.err (!%p796_p5)
}
  0x2e   :  { %58 = dma.hbm_to_vmem [thread:$0]  %s1005_s3, 128, %s56_s14, [#allocation9]  }
  0x2f   :  { %860 = dma.done.wait [#allocation3], 128  }
  0x30   :  { %861 = vsyncadd [#allocation3], 4294967168 }
  0x31   :  { %862 = dma.done.wait [#allocation6], 1792  }
  0x32   :  { %863 = vsyncadd [#allocation6], 4294965504 }
  0x33   :  { %864 = dma.done.wait [#allocation9], 128  }
  0x34   :  { %865 = vsyncadd [#allocation9], 4294967168  ;;  %v876_v0 = vmov 0.0   ;;  %vm877_vm0 = vmmov 0   ;;  %v699_v1 = vld [vmem:[#allocation7] sm:$0xff]   ;;  %v72_v2 = vld [vmem:[#allocation2] sm:$0xff]  ;;  %v175_v31 = vlaneseq }
  0x35   :  { %624 = vmatprep.subr.bf16.mxu0 %v876_v0  ;;  %626 = vmatprep.mubr.msk.bf16.mxu0 %vm877_vm0, %v876_v0  ;;  %vm108_vm1 = vcmask 130048   ;;  %v101_v3 = vpack.c.bf16 %v72_v2, %v72_v2  ;;  %v700_v4 = vld [vmem:[#allocation7 + $0x10] sm:$0xff]   ;;  %v701_v5 = vld [vmem:[#allocation7 + $0x8] sm:$0xff]   ;;  %v702_v6 = vld [vmem:[#allocation7 + $0x20] sm:$0xff]   ;;  %vm152_vm2 = vcmask 523264   ;;  %vm201_vm4 = vcmask 261120  }
  0x36   :  { %630 = vmatprep.subr.bf16.mxu1 %v876_v0  ;;  %634 = vmatprep.mubr.msk.bf16.mxu1 %vm877_vm0, %v876_v0  ;;  %v703_v7 = vld [vmem:[#allocation7 + $0x18] sm:$0xff]   ;;  %v943_v32 = vshrl.u32 %v175_v31, 7  ;;  %v945_v33 = vld [vmem:[#allocation8] sm:$0xff]  ;;  %s878_s2 = smov 96   ;;  %v704_v45 = vld [vmem:[#allocation7 + $0x60] sm:$0xff]   ;;  %s879_s3 = smov 120  }
  0x37   :  { %625 = vmatpush3.bf16.msra.mxu0 %v699_v1  ;;  %631 = vmatpush3.bf16.msra.mxu1 %v700_v4  ;;  %v705_v46 = vld [vmem:[#allocation7 + $0x58] sm:$0xff]   ;;  %v706_v47 = vld [vmem:[#allocation7 + $0x50] sm:$0xff]   ;;  %v707_v48 = vld [vmem:[#allocation7 + $0x48] sm:$0xff]   ;;  %s880_s17 = smov [#allocation11]   ;;  %vm534_vm7 = vcmask 64512  }
  0x38   :  { %638 = vmatprep.subr.bf16.mxu0 %v876_v0  ;;  %632 = vmatprep.subr.bf16.mxu1 %v876_v0  ;;  %v177_v34 = vsub.s32 0, %v943_v32  ;;  %v182_v35 = vsub.s32 1, %v943_v32  ;;  %v708_v49 = vld [vmem:[#allocation7 + $0x40] sm:$0xff]   ;;  %v709_v50 = vld [vmem:[#allocation7 + $0x38] sm:$0xff]   ;;  %v710_v52 = vld [vmem:[#allocation7 + $0x30] sm:$0xff]   ;;  %s554_s18 = sshll.u32 %s880_s17, 4  ;;  %s555_s18 = int_to_ptr.vmem [resolvable:$true] %s554_s18 }
  0x39   :  { %473 = vrot.lane.b32.xlu1 %v705_v46, %s879_s3  ;;  %v711_v53 = vld [vmem:[#allocation7 + $0x28] sm:$0xff]   ;;  %s800_s19 = scalar_lea.vmem %s555_s18, 128  ;;  %p805_p7 = scmp.lt.s32.totalorder %s555_s18, %s555_s18 }
  0x3a   :  { %627 = vmatmul.mubr.msk.bf16.vlgmr.msra.gmra.mxu0 %vm108_vm1, %v101_v3  ;;  %v183_v39 = vrot.slane %v945_v33, %v182_v35  ;;  %p801_p6 = scmp.ne.s32.totalorder %s555_s18, %s800_s19  ;;  %p806_p8 = scmp.lt.s32.totalorder %s800_s19, %s800_s19 }
  0x3b   :  { %642 = vmatprep.mubr.msk.bf16.mxu0 %vm877_vm0, %v876_v0  ;;  %633 = vmatpush3.bf16.msra.mxu1 %v701_v5 }
  0x3c   :  { %646 = vmatprep.subr.bf16.mxu1 %v876_v0  ;;  %639 = vmatpush3.bf16.msra.mxu0 %v702_v6  ;;  %p807_p9 = por %p806_p8, %p805_p7 }
  0x3d   :  { %640 = vmatprep.subr.bf16.mxu0 %v876_v0  ;;  %471 = vrot.lane.b32.xlu1 %v706_v47, %s879_s3 }
  0x3e   :  { %p808_p10 = pnand %p807_p9, %p801_p6 }
  0x40   :  { %641 = vmatpush3.bf16.msra.mxu0 %v703_v7 }
  0x41   :  { %666 = vmatprep.subr.bf16.mxu0 %v876_v0  ;;  %467 = vrot.lane.b32.xlu1 %v708_v49, %s879_s3 }
  0x45   :  { %463 = vrot.lane.b32.xlu1 %v710_v52, %s879_s3 }
  0xab   :  { %v474_v7 = vpop.permute.xlu1 %473 }
  0xfa   :  { %v146_v8 = vpop.f32.mrf.mxu0 }
  0xfb   :  { %v153_v9 = vsel %vm152_vm2, %v146_v8, 0.0 }
  0xfc   :  { %v154_v10 = vrot.slane %v153_v9, 4  ;;  %v628_v11 = vpop.f32.mrf.mxu0 }
  0xfe   :  { %v155_v12 = vadd.f32 %v154_v10, %v153_v9  ;;  %v149_v13 = vpop.f32.mrf.mxu0  ;;  %v472_v10 = vpop.permute.xlu1 %471 }
 0x100   :  { %v156_v14 = vrot.slane %v155_v12, 2  ;;  %v629_v15 = vpop.f32.mrf.mxu0 }
 0x102   :  { %v157_v16 = vadd.f32 %v156_v14, %v155_v12 }
 0x104   :  { %v158_v17 = vrot.slane %v157_v16, 1 }
 0x106   :  { %v159_v18 = vadd.f32 %v158_v17, %v157_v16  ;;  %v468_v16 = vpop.permute.xlu1 %467 }
 0x108   :  { %v161_v19 = vmul.f32 0.125, %v159_v18 }
 0x10a   :  { %v162_v20 = vsub.f32 %v146_v8, %v161_v19  ;;  %v464_v18 = vpop.permute.xlu1 %463 }
 0x10c   :  { %v163_v21 = vmul.f32 %v162_v20, %v162_v20 }
 0x10e   :  { %v164_v22 = vsel %vm152_vm2, %v163_v21, 0.0  ;;  %v271_v21 = vsub.s32 3, %v943_v32 }
 0x10f   :  { %v165_v23 = vrot.slane %v164_v22, 4 }
 0x111   :  { %v166_v24 = vadd.f32 %v165_v23, %v164_v22 }
 0x113   :  { %v167_v25 = vrot.slane %v166_v24, 2 }
 0x115   :  { %v168_v26 = vadd.f32 %v167_v25, %v166_v24  ;;  %v370_v24 = vsub.s32 6, %v943_v32 }
 0x117   :  { %v169_v27 = vrot.slane %v168_v26, 1 }
 0x119   :  { %v170_v28 = vadd.f32 %v169_v27, %v168_v26  ;;  %v272_v26 = vrot.slane %v945_v33, %v271_v21  ;;  %v371_v27 = vrot.slane %v945_v33, %v370_v24 }
 0x11b   :  { %v171_v29 = vmul.f32 0.125, %v170_v28  ;;  %486 = vrot.lane.b32.xlu1 %v371_v27, %s879_s3 }
 0x11d   :  { %v172_v30 = vadd.f32 1e-05, %v171_v29 }
 0x11f   :  { %712 = vrsqrt.f32 %v172_v30 }
 0x12c   :  { %v713_v36 = vpop.eup %712 }
 0x12d   :  { %v174_v37 = vmul.f32 %v713_v36, %v945_v33 }
 0x12f   :  { %v178_v38 = vrot.slane %v174_v37, %v177_v34 }
 0x131   :  { %v179_v40 = vmul.f32 %v178_v38, %v162_v20  ;;  %v266_v20 = vsub.s32 2, %v943_v32 }
 0x133   :  { %v184_v41 = vadd.f32 %v183_v39, %v179_v40 }
 0x135   :  { %vm185_vm3 = vcmp.ge.f32.partialorder %v184_v41, 0.0  ;;  %v186_v42 = vmul.f32 0.01, %v184_v41 }
 0x137   :  { %v187_v43 = vsel %vm185_vm3, %v184_v41, %v186_v42 }
 0x138   :  { %v188_v44 = vpack.c.bf16 %v187_v43, %v187_v43 }
 0x13a   :  { %278 = vrot.lane.b32.xlu0 %v188_v44, %s878_s2  ;;  %635 = vmatmul.mubr.msk.bf16.vlgmr.msra.gmra.mxu1 %vm201_vm4, %v188_v44 }
 0x13b   :  { %662 = vmatprep.mubr.msk.bf16.mxu1 %vm877_vm0, %v876_v0  ;;  %647 = vmatpush3.bf16.msra.mxu1 %v704_v45 }
 0x13c   :  { %648 = vmatprep.subr.bf16.mxu1 %v876_v0 }
 0x13e   :  { %475 = vrot.lane.b32.xlu0 %v704_v45, %s879_s3 }
 0x13f   :  { %649 = vmatpush3.bf16.msra.mxu1 %v705_v46 }
 0x140   :  { %650 = vmatprep.subr.bf16.mxu1 %v876_v0 }
 0x142   :  { %469 = vrot.lane.b32.xlu0 %v707_v48, %s879_s3 }
 0x143   :  { %651 = vmatpush3.bf16.msra.mxu1 %v706_v47 }
 0x144   :  { %652 = vmatprep.subr.bf16.mxu1 %v876_v0 }
 0x146   :  { %465 = vrot.lane.b32.xlu0 %v709_v50, %s879_s3 }
 0x147   :  { %653 = vmatpush3.bf16.msra.mxu1 %v707_v48 }
 0x148   :  { %654 = vmatprep.subr.bf16.mxu1 %v876_v0 }
 0x14a   :  { %461 = vrot.lane.b32.xlu0 %v711_v53, %s879_s3 }
 0x14b   :  { %655 = vmatpush3.bf16.msra.mxu1 %v708_v49 }
 0x14c   :  { %656 = vmatprep.subr.bf16.mxu1 %v876_v0 }
 0x14f   :  { %657 = vmatpush3.bf16.msra.mxu1 %v709_v50 }
 0x150   :  { %658 = vmatprep.subr.bf16.mxu1 %v876_v0 }
 0x153   :  { %659 = vmatpush3.bf16.msra.mxu1 %v710_v52 }
 0x154   :  { %660 = vmatprep.subr.bf16.mxu1 %v876_v0 }
 0x157   :  { %661 = vmatpush3.bf16.msra.mxu1 %v711_v53 }
 0x1ac   :  { %v279_v51 = vpop.permute.xlu0 %278 }
 0x1ad   :  { %643 = vmatmul.mubr.msk.bf16.vlgmr.msra.gmra.mxu0 %vm201_vm4, %v279_v51 }
 0x1ae   :  { %682 = vmatprep.mubr.msk.bf16.mxu0 %vm877_vm0, %v876_v0 }
 0x1b0   :  { %v476_v4 = vpop.permute.xlu0 %475 }
 0x1b1   :  { %667 = vmatpush3.bf16.msra.mxu0 %v476_v4 }
 0x1b2   :  { %668 = vmatprep.subr.bf16.mxu0 %v876_v0 }
 0x1b4   :  { %v470_v13 = vpop.permute.xlu0 %469 }
 0x1b5   :  { %669 = vmatpush3.bf16.msra.mxu0 %v474_v7 }
 0x1b6   :  { %670 = vmatprep.subr.bf16.mxu0 %v876_v0 }
 0x1b8   :  { %v466_v17 = vpop.permute.xlu0 %465 }
 0x1b9   :  { %671 = vmatpush3.bf16.msra.mxu0 %v472_v10 }
 0x1ba   :  { %672 = vmatprep.subr.bf16.mxu0 %v876_v0 }
 0x1bc   :  { %v462_v19 = vpop.permute.xlu0 %461 }
 0x1bd   :  { %673 = vmatpush3.bf16.msra.mxu0 %v470_v13 }
 0x1be   :  { %674 = vmatprep.subr.bf16.mxu0 %v876_v0 }
 0x1c1   :  { %675 = vmatpush3.bf16.msra.mxu0 %v468_v16 }
 0x1c2   :  { %676 = vmatprep.subr.bf16.mxu0 %v876_v0 }
 0x1c5   :  { %677 = vmatpush3.bf16.msra.mxu0 %v466_v17 }
 0x1c6   :  { %678 = vmatprep.subr.bf16.mxu0 %v876_v0 }
 0x1c9   :  { %679 = vmatpush3.bf16.msra.mxu0 %v464_v18 }
 0x1ca   :  { %680 = vmatprep.subr.bf16.mxu0 %v876_v0 }
 0x1cd   :  { %681 = vmatpush3.bf16.msra.mxu0 %v462_v19 }
 0x1fa   :  { %v239_v54 = vpop.f32.mrf.mxu1 }
 0x1fb   :  { %v245_v55 = vrot.slane %v239_v54, 4 }
 0x1fc   :  { %v636_v56 = vpop.f32.mrf.mxu1 }
 0x1fd   :  { %v246_v57 = vadd.f32 %v245_v55, %v239_v54  ;;  %v356_v55 = vsub.s32 4, %v943_v32  ;;  %v361_v56 = vsub.s32 5, %v943_v32 }
 0x1fe   :  { %v242_v58 = vpop.f32.mrf.mxu1 }
 0x1ff   :  { %v247_v59 = vrot.slane %v246_v57, 2 }
 0x200   :  { %v637_v60 = vpop.f32.mrf.mxu1 }
 0x201   :  { %v248_v61 = vadd.f32 %v247_v59, %v246_v57  ;;  %v362_v60 = vrot.slane %v945_v33, %v361_v56 }
 0x203   :  { %v249_v62 = vrot.slane %v248_v61, 1 }
 0x205   :  { %v250_v63 = vadd.f32 %v249_v62, %v248_v61 }
 0x207   :  { %v251_v1 = vmul.f32 0.125, %v250_v63 }
 0x209   :  { %v252_v2 = vsub.f32 %v239_v54, %v251_v1 }
 0x20b   :  { %v253_v3 = vmul.f32 %v252_v2, %v252_v2 }
 0x20d   :  { %v254_v5 = vrot.slane %v253_v3, 4 }
 0x20f   :  { %v255_v6 = vadd.f32 %v254_v5, %v253_v3 }
 0x211   :  { %v256_v8 = vrot.slane %v255_v6, 2 }
 0x213   :  { %v257_v9 = vadd.f32 %v256_v8, %v255_v6 }
 0x215   :  { %v258_v11 = vrot.slane %v257_v9, 1 }
 0x217   :  { %v259_v12 = vadd.f32 %v258_v11, %v257_v9 }
 0x219   :  { %v260_v14 = vmul.f32 0.125, %v259_v12 }
 0x21b   :  { %v261_v15 = vadd.f32 1e-05, %v260_v14 }
 0x21d   :  { %714 = vrsqrt.f32 %v261_v15 }
 0x22a   :  { %v715_v22 = vpop.eup %714 }
 0x22b   :  { %v263_v23 = vmul.f32 %v715_v22, %v945_v33 }
 0x22d   :  { %v267_v25 = vrot.slane %v263_v23, %v266_v20 }
 0x22f   :  { %v268_v28 = vmul.f32 %v267_v25, %v252_v2 }
 0x231   :  { %v273_v0 = vadd.f32 %v272_v26, %v268_v28 }
 0x233   :  { %v275_v29 = vmul.f32 0.01, %v273_v0  ;;  %vm274_vm5 = vcmp.ge.f32.partialorder %v273_v0, 0.0 }
 0x235   :  { %v276_v30 = vsel %vm274_vm5, %v273_v0, %v275_v29 }
 0x236   :  { %v367_v31 = vpack.c.bf16 %v276_v30, %v276_v30 }
 0x238   :  { %663 = vmatmul.mubr.bf16.vlgmr.msra.gmra.mxu1 %v367_v31 }
 0x26d   :  { %v329_v34 = vpop.f32.mrf.mxu0 }
 0x26e   :  { %v335_v35 = vrot.slane %v329_v34, 4 }
 0x26f   :  { %v644_v36 = vpop.f32.mrf.mxu0 }
 0x270   :  { %v336_v37 = vadd.f32 %v335_v35, %v329_v34 }
 0x271   :  { %v332_v38 = vpop.f32.mrf.mxu0 }
 0x272   :  { %v337_v39 = vrot.slane %v336_v37, 2 }
 0x273   :  { %v645_v40 = vpop.f32.mrf.mxu0 }
 0x274   :  { %v338_v41 = vadd.f32 %v337_v39, %v336_v37 }
 0x276   :  { %v339_v42 = vrot.slane %v338_v41, 1 }
 0x278   :  { %v340_v43 = vadd.f32 %v339_v42, %v338_v41 }
 0x27a   :  { %v341_v44 = vmul.f32 0.125, %v340_v43 }
 0x27c   :  { %v342_v45 = vsub.f32 %v329_v34, %v341_v44 }
 0x27e   :  { %v343_v46 = vmul.f32 %v342_v45, %v342_v45 }
 0x280   :  { %v344_v47 = vrot.slane %v343_v46, 4 }
 0x282   :  { %v345_v48 = vadd.f32 %v344_v47, %v343_v46 }
 0x284   :  { %v346_v49 = vrot.slane %v345_v48, 2 }
 0x286   :  { %v347_v50 = vadd.f32 %v346_v49, %v345_v48 }
 0x288   :  { %v348_v51 = vrot.slane %v347_v50, 1 }
 0x28a   :  { %v349_v52 = vadd.f32 %v348_v51, %v347_v50 }
 0x28c   :  { %v350_v53 = vmul.f32 0.125, %v349_v52 }
 0x28e   :  { %v351_v54 = vadd.f32 1e-05, %v350_v53 }
 0x290   :  { %716 = vrsqrt.f32 %v351_v54 }
 0x29d   :  { %v717_v57 = vpop.eup %716 }
 0x29e   :  { %v353_v58 = vmul.f32 %v717_v57, %v945_v33 }
 0x2a0   :  { %v357_v59 = vrot.slane %v353_v58, %v356_v55 }
 0x2a2   :  { %v358_v61 = vmul.f32 %v357_v59, %v342_v45 }
 0x2a4   :  { %v363_v62 = vadd.f32 %v362_v60, %v358_v61 }
 0x2a6   :  { %v365_v63 = vmul.f32 0.01, %v363_v62  ;;  %vm364_vm6 = vcmp.ge.f32.partialorder %v363_v62, 0.0 }
 0x2a8   :  { %v366_v1 = vsel %vm364_vm6, %v363_v62, %v365_v63 }
 0x2a9   :  { %v460_v2 = vpack.c.bf16 %v366_v1, %v366_v1 }
 0x2ab   :  { %683 = vmatmul.mubr.bf16.vlgmr.msra.gmra.mxu0 %v460_v2 }
 0x2f8   :  { %v454_v3 = vpop.f32.mrf.mxu1 }
 0x2f9   :  { %v455_v4 = vadd.f32 %v454_v3, %v371_v27 }
 0x2fa   :  { %v664_v32 = vpop.f32.mrf.mxu1 }
 0x2fb   :  { %536 = vst.msk [vmem:[#allocation11] sm:$0xff] %vm534_vm7, %v455_v4 }
 0x2fc   :  { %v457_v5 = vpop.f32.mrf.mxu1 }
 0x2fd   :  { %811 = shalt.err (!%p808_p10)
}
 0x2fe   :  { %557 = dma.vmem_to_hbm [thread:$0]  %s555_s18, 128, %s1007_s5, [#allocation12]   ;;  %v665_v33 = vpop.f32.mrf.mxu1  ;;  %v487_v6 = vpop.permute.xlu1 %486  ;;  %v73_v14 = vld [vmem:[#allocation5] sm:$0xff] }
 0x2ff   :  { %s881_s22 = smov [#allocation13]   ;;  %s882_s24 = smov [#allocation10]  }
 0x300   :  { %s564_s23 = sshll.u32 %s881_s22, 4  ;;  %s544_s25 = sshll.u32 %s882_s24, 4  ;;  %s565_s23 = int_to_ptr.vmem [resolvable:$true] %s564_s23  ;;  %s545_s25 = int_to_ptr.vmem [resolvable:$true] %s544_s25 }
 0x301   :  { %s820_s5 = scalar_lea.vmem %s565_s23, 128  ;;  %p825_p12 = scmp.lt.s32.totalorder %s565_s23, %s565_s23 }
 0x302   :  { %p821_p11 = scmp.ne.s32.totalorder %s565_s23, %s820_s5  ;;  %p826_p13 = scmp.lt.s32.totalorder %s820_s5, %s820_s5 }
 0x304   :  { %p827_p0 = por %p826_p13, %p825_p12 }
 0x306   :  { %p828_p1 = pnand %p827_p0, %p821_p11 }
 0x36b   :  { %v523_v7 = vpop.f32.mrf.mxu0 }
 0x36c   :  { %v524_v8 = vadd.f32 %v523_v7, %v487_v6 }
 0x36d   :  { %v684_v9 = vpop.f32.mrf.mxu0 }
 0x36e   :  { %v529_v10 = vmul.f32 0.5, %v524_v8 }
 0x36f   :  { %v526_v11 = vpop.f32.mrf.mxu0 }
 0x370   :  { %v530_v12 = vmul.f32 1.442695, %v529_v10 }
 0x371   :  { %v685_v13 = vpop.f32.mrf.mxu0 }
 0x372   :  { %718 = vpow2.f32 %v530_v12 }
 0x37f   :  { %v719_v15 = vpop.eup %718 }
 0x380   :  { %537 = vst.msk [vmem:[#allocation13] sm:$0xff] %vm534_vm7, %v719_v15  ;;  %v532_v16 = vmul.f32 %v719_v15, %v73_v14 }
 0x381   :  { %831 = shalt.err (!%p828_p1)
}
 0x382   :  { %567 = dma.vmem_to_hbm [thread:$0]  %s565_s23, 128, %s1008_s6, [#allocation12]   ;;  %v533_v17 = vadd.f32 %v532_v16, %v455_v4 }
 0x383   :  { %s840_s28 = scalar_lea.vmem %s545_s25, 128  ;;  %p845_p3 = scmp.lt.s32.totalorder %s545_s25, %s545_s25 }
 0x384   :  { %535 = vst.msk [vmem:[#allocation10] sm:$0xff] %vm534_vm7, %v533_v17  ;;  %p841_p2 = scmp.ne.s32.totalorder %s545_s25, %s840_s28  ;;  %p846_p4 = scmp.lt.s32.totalorder %s840_s28, %s840_s28 }
 0x386   :  { %p847_p5 = por %p846_p4, %p845_p3 }
 0x388   :  { %p848_p6 = pnand %p847_p5, %p841_p2 }
 0x38a   :  { %851 = shalt.err (!%p848_p6)
}
 0x38b   :  { %547 = dma.vmem_to_hbm [thread:$0]  %s545_s25, 128, %s1006_s4, [#allocation4]  }
 0x38c   :  { %866 = dma.done.wait [#allocation4], 128  }
 0x38d   :  { %867 = vsyncadd [#allocation4], 4294967168 }
 0x38e   :  { %868 = dma.done.wait [#allocation12], 256  }
 0x38f   :  { %869 = vsyncadd [#allocation12], 4294967040 }
 0x390   :  { %577 = vsyncpa [#allocation3], 1 }
 0x391   :  { %578 = vsyncpa [#allocation6], 1 }
 0x392   :  { %579 = vsyncpa [#allocation9], 1 }
 0x393   :  { %580 = vsyncpa [#allocation4], 1 }
 0x394   :  { %581 = vsyncpa [#allocation12], 1 }

</bundles_post_ra>
